<compile_context>
chip_gen: v5e
topology: v5e:2x2
jax: 0.10.0
libtpu: 0.0.40
codegen_flags: <defaults>
</compile_context>

<pallas_src>
import jax
import jax.numpy as jnp
from jax.experimental import pallas as pl
from jax.experimental.pallas import tpu as pltpu


# ---------------------------------------------------------------------------
# Small helpers
# ---------------------------------------------------------------------------

def _round_up(n, m):
    return ((n + m - 1) // m) * m


def _pad_last(v, target):
    c = v.shape[-1]
    if c == target:
        return v
    return jnp.pad(v, [(0, 0)] * (v.ndim - 1) + [(0, target - c)])


# ---------------------------------------------------------------------------
# Pallas kernel 1: tap-packed 3x3 conv as a single bf16 matmul per row tile,
#                  f32 accumulation + fused, row-masked BN partial sums.
# ---------------------------------------------------------------------------

def _make_conv_stats_kernel(m_total, tm):
    def kernel(x_ref, w_ref, o_ref, stat_ref):
        # x_ref: (tm, Kp) bf16 packed patches; w_ref: (Kp, Cout_p) bf16
        # o_ref: (tm, Cout_p) bf16 pre-activation
        # stat_ref: (1, 2, Cout_p) f32 per-tile [sum; sum of squares]
        acc = jnp.dot(x_ref[...], w_ref[...],
                      preferred_element_type=jnp.float32)
        o_ref[...] = acc.astype(o_ref.dtype)
        # Mask rows past the real M so undefined tail-block rows cannot
        # poison the BN batch statistics (tail output rows are dropped on
        # writeback anyway).
        row = (jax.lax.broadcasted_iota(jnp.int32, acc.shape, 0)
               + pl.program_id(0) * tm)
        acc_m = jnp.where(row < m_total, acc, 0.0)
        stat_ref[0, 0:1, :] = jnp.sum(acc_m, axis=0, keepdims=True)
        stat_ref[0, 1:2, :] = jnp.sum(acc_m * acc_m, axis=0, keepdims=True)
    return kernel


def pallas_conv3x3_packed(patches, w_packed, *, tm=512):
    """patches: (M, Kp) bf16; w_packed: (Kp, Cout_p) bf16."""
    M, kp = patches.shape
    _, cout_p = w_packed.shape
    tm = max(8, min(tm, _round_up(M, 8)))
    n_tiles = pl.cdiv(M, tm)
    conv, stats = pl.pallas_call(
        _make_conv_stats_kernel(M, tm),
        out_shape=(jax.ShapeDtypeStruct((M, cout_p), jnp.bfloat16),
                   jax.ShapeDtypeStruct((n_tiles, 2, cout_p), jnp.float32)),
        grid=(n_tiles,),
        in_specs=[
            pl.BlockSpec((tm, kp), lambda i: (i, 0)),
            # Constant block index -> weight is DMA'd once and stays resident.
            # TODO(synk): pipeline_mode=pl.Buffered(1) + K/N tiling once
            # channel counts reach production sizes.
            pl.BlockSpec((kp, cout_p), lambda i: (0, 0)),
        ],
        out_specs=(
            pl.BlockSpec((tm, cout_p), lambda i: (i, 0)),
            pl.BlockSpec((1, 2, cout_p), lambda i: (i, 0, 0)),
        ),
        compiler_params=pltpu.CompilerParams(
            dimension_semantics=("parallel",),
            vmem_limit_bytes=32 * 1024 * 1024),
    )(patches, w_packed)
    return conv, stats


# ---------------------------------------------------------------------------
# Pallas kernel 2: fused BN affine + LeakyReLU(0.01), lane-dense, 1024-row tiles
# ---------------------------------------------------------------------------

def _bn_leaky_kernel(x_ref, s_ref, b_ref, o_ref):
    y = x_ref[...].astype(jnp.float32) * s_ref[...] + b_ref[...]
    o_ref[...] = jnp.where(y >= 0.0, y, 0.01 * y).astype(o_ref.dtype)


def pallas_bn_leaky(x, scale, bias, out_dtype, *, tm=1024):
    """x: (M, Cp) rows of pixels (Cp multiple of 128); scale/bias: (Cp,) f32."""
    M, C = x.shape
    tm = max(8, min(tm, _round_up(M, 8)))   # masked tail block, no jnp.pad
    return pl.pallas_call(
        _bn_leaky_kernel,
        out_shape=jax.ShapeDtypeStruct((M, C), out_dtype),
        grid=(pl.cdiv(M, tm),),
        in_specs=[pl.BlockSpec((tm, C), lambda i: (i, 0)),
                  pl.BlockSpec((1, C), lambda i: (0, 0)),
                  pl.BlockSpec((1, C), lambda i: (0, 0))],
        out_specs=pl.BlockSpec((tm, C), lambda i: (i, 0)),
        compiler_params=pltpu.CompilerParams(
            dimension_semantics=("parallel",),
            vmem_limit_bytes=32 * 1024 * 1024),
    )(x, scale.reshape(1, C), bias.reshape(1, C))


# ---------------------------------------------------------------------------
# JAX-side glue: tap-packed im2col, weight packing, nearest resize
# ---------------------------------------------------------------------------

def _im2col_pack(x_nhwc, stride, kp):
    """3x3, pad=1 im2col with the 9 taps packed along the channel (K) dim.

    Returns (patches (N*OH*OW, kp) bf16, OH, OW).  Packed channel order is
    (di, dj, c), matching _prep_weight_packed.
    """
    N, H, W, C = x_nhwc.shape
    OH = (H + 2 - 3) // stride + 1
    OW = (W + 2 - 3) // stride + 1
    xp = jnp.pad(x_nhwc.astype(jnp.bfloat16),
                 ((0, 0), (1, 1), (1, 1), (0, 0)))
    taps = []
    for di in range(3):
        for dj in range(3):
            taps.append(xp[:, di:di + stride * (OH - 1) + 1:stride,
                           dj:dj + stride * (OW - 1) + 1:stride, :])
    patches = jnp.concatenate(taps, axis=-1)                # (N, OH, OW, 9*C)
    patches = jnp.pad(patches,
                      ((0, 0), (0, 0), (0, 0), (0, kp - 9 * C)))
    return patches.reshape(N * OH * OW, kp), OH, OW


def _prep_weight_packed(w_oihw, kp, cout_p):
    """PyTorch OIHW 3x3 weight -> (Kp, Cout_p) bf16, row order (di, dj, c)."""
    Cout, Cin, KH, KW = w_oihw.shape
    w = jnp.transpose(w_oihw.astype(jnp.float32), (2, 3, 1, 0))
    w = w.reshape(KH * KW * Cin, Cout)
    w = jnp.pad(w, ((0, kp - KH * KW * Cin), (0, cout_p - Cout)))
    return w.astype(jnp.bfloat16)


def _nearest_resize_nhwc(x, oh, ow):
    # matches F.interpolate(mode='nearest'): src_idx = floor(dst_idx * in / out)
    N, H, W, C = x.shape
    ih = (jnp.arange(oh) * H // oh).astype(jnp.int32)
    iw = (jnp.arange(ow) * W // ow).astype(jnp.int32)
    return x[:, ih][:, :, iw]


# ---------------------------------------------------------------------------
# BasicConv (Conv2d bias=False + BatchNorm2d training-mode + LeakyReLU(0.01))
# ---------------------------------------------------------------------------

def basic_conv_block(x_nhwc, w_oihw, gamma, beta, *, stride, out_dtype,
                     eps=1e-5):
    N, H, W, Cin = x_nhwc.shape
    Cout = w_oihw.shape[0]
    kp = _round_up(9 * Cin, 128)
    cout_p = _round_up(Cout, 128)

    patches, OH, OW = _im2col_pack(x_nhwc, stride, kp)
    w = _prep_weight_packed(w_oihw, kp, cout_p)

    # Conv pre-activation in bf16 + f32 BN partials, single Pallas pass.
    conv, stats = pallas_conv3x3_packed(patches, w)

    # BN batch statistics (biased variance) from the in-kernel f32 partials.
    M = N * OH * OW
    count = float(M)
    s = jnp.sum(stats[:, 0, :], axis=0)
    ss = jnp.sum(stats[:, 1, :], axis=0)
    mean = s / count
    var = jnp.maximum(ss / count - mean * mean, 0.0)
    gamma_p = _pad_last(gamma.astype(jnp.float32), cout_p)
    beta_p = _pad_last(beta.astype(jnp.float32), cout_p)
    scale = gamma_p * jax.lax.rsqrt(var + eps)
    bias = beta_p - mean * scale

    # NOTE: pre-activation is bf16 while mean/var come from the f32
    # accumulator -- slight deviation from PyTorch's all-f32 conv+BN.
    y = pallas_bn_leaky(conv, scale, bias, out_dtype)
    return y.reshape(N, OH, OW, cout_p)[..., :Cout]


def conv2x_forward(x_nchw, rem_nchw, w1, g1, b1, w2, g2, b2):
    """Conv2x.forward for the default (2D, non-deconv, concat) configuration."""
    x = jnp.transpose(x_nchw, (0, 2, 3, 1))        # NCHW -> NHWC
    rem = jnp.transpose(rem_nchw, (0, 2, 3, 1))

    # conv1: stride-2 BasicConv; intermediate activations kept in bf16.
    y = basic_conv_block(x, w1, g1, b1, stride=2, out_dtype=jnp.bfloat16)
    if y.shape != rem.shape:
        y = _nearest_resize_nhwc(y, rem.shape[1], rem.shape[2])
    y = jnp.concatenate([y, rem.astype(y.dtype)], axis=-1)

    # conv2: stride-1 BasicConv; only the final BN+LeakyReLU emits f32.
    y = basic_conv_block(y, w2, g2, b2, stride=1, out_dtype=jnp.float32)
    return jnp.transpose(y, (0, 3, 1, 2))          # NHWC -> NCHW


# ---------------------------------------------------------------------------
# Demo
# ---------------------------------------------------------------------------

if __name__ == "__main__":
    key = jax.random.PRNGKey(0)
    k1, k2, k3, k4 = jax.random.split(key, 4)

    N, Cin, H, W = 2, 4, 16, 16
    Cout = 8

    x = jax.random.normal(k1, (N, Cin, H, W), jnp.float32)
    # rem matches conv1's output spatial size (H/2, W/2) and has Cout channels.
    rem = jax.random.normal(k2, (N, Cout, H // 2, W // 2), jnp.float32)

    # Conv weights in PyTorch OIHW layout; BN defaults gamma=1, beta=0.
    w1 = 0.1 * jax.random.normal(k3, (Cout, Cin, 3, 3), jnp.float32)
    w2 = 0.1 * jax.random.normal(k4, (2 * Cout, 2 * Cout, 3, 3), jnp.float32)
    g1 = jnp.ones((Cout,), jnp.float32)
    b1 = jnp.zeros((Cout,), jnp.float32)
    g2 = jnp.ones((2 * Cout,), jnp.float32)
    b2 = jnp.zeros((2 * Cout,), jnp.float32)

    fwd = jax.jit(conv2x_forward)
    out = fwd(x, rem, w1, g1, b1, w2, g2, b2)
    jax.block_until_ready(out)
    assert out.shape == (N, 2 * Cout, H // 2, W // 2)
    assert out.dtype == jnp.float32
    print("KERNEL_OK")
</pallas_src>

<mosaic_0001>
module attributes {stable_mosaic.version = 11 : i64} {
  func.func @kernel(%arg0: i32, %arg1: memref<128x128xbf16, #tpu.memory_space<vmem>>, %arg2: memref<128x128xbf16, #tpu.memory_space<vmem>>, %arg3: memref<128x128xbf16, #tpu.memory_space<vmem>>, %arg4: memref<1x2x128xf32, #tpu.memory_space<vmem>>) attributes {dimension_semantics = [#tpu.dimension_semantics<parallel>], iteration_bounds = array<i64: 1>, scalar_prefetch = 0 : i64, scratch_operands = 0 : i64, tpu.core_type = #tpu.core_type<tc>, window_params = [{transform_indices = @transform_0, window_bounds = array<i64: 128, 128>}, {pipeline_mode = #tpu.pipeline_mode<synchronous>, transform_indices = @transform_1, window_bounds = array<i64: 128, 128>}, {transform_indices = @transform_2, window_bounds = array<i64: 128, 128>}, {transform_indices = @transform_3, window_bounds = array<i64: 1, 2, 128>}]} {
    %c0 = arith.constant 0 : index
    %c0_0 = arith.constant 0 : index
    %0 = vector.load %arg1[%c0, %c0_0] : memref<128x128xbf16, #tpu.memory_space<vmem>>, vector<128x128xbf16>
    %c0_1 = arith.constant 0 : index
    %c0_2 = arith.constant 0 : index
    %1 = vector.load %arg2[%c0_1, %c0_2] : memref<128x128xbf16, #tpu.memory_space<vmem>>, vector<128x128xbf16>
    %cst = arith.constant dense<0.000000e+00> : vector<128x128xf32>
    %2 = tpu.matmul %0, %1, %cst {dimension_numbers = #tpu.dot_dimension_numbers<[1], [0], [0], [1], [0, 0, 1, 1], [], []>} : vector<128x128xbf16>, vector<128x128xbf16>, vector<128x128xf32> -> vector<128x128xf32>
    %3 = arith.truncf %2 : vector<128x128xf32> to vector<128x128xbf16>
    %c0_3 = arith.constant 0 : index
    %c0_4 = arith.constant 0 : index
    %4 = vector.load %arg3[%c0_3, %c0_4] : memref<128x128xbf16, #tpu.memory_space<vmem>>, vector<128x128xbf16>
    tpu.vector_store %arg3[%c0_3, %c0_4], %3 {strides = array<i32>} : memref<128x128xbf16, #tpu.memory_space<vmem>>, vector<128x128xbf16>,
    %5 = tpu.iota {dimensions = array<i32: 0>} : vector<128x128xi32>
    %c128_i32 = arith.constant 128 : i32
    %6 = arith.muli %arg0, %c128_i32 : i32
    %7 = vector.broadcast %6 : i32 to vector<128x128xi32>
    %8 = arith.addi %5, %7 : vector<128x128xi32>
    %c128_i32_5 = arith.constant 128 : i32
    %9 = vector.broadcast %c128_i32_5 : i32 to vector<128x128xi32>
    %10 = arith.cmpi slt, %8, %9 : vector<128x128xi32>
    %cst_6 = arith.constant 0.000000e+00 : f32
    %11 = vector.broadcast %cst_6 : f32 to vector<128x128xf32>
    %12 = arith.select %10, %2, %11 : vector<128x128xi1>, vector<128x128xf32>
    %cst_7 = arith.constant dense<0.000000e+00> : vector<128xf32>
    %13 = vector.multi_reduction <add>, %12, %cst_7 [0] : vector<128x128xf32> to vector<128xf32>
    %14 = vector.shape_cast %13 : vector<128xf32> to vector<1x128xf32>
    %c0_8 = arith.constant 0 : index
    %c0_9 = arith.constant 0 : index
    %c0_10 = arith.constant 0 : index
    %15 = vector.load %arg4[%c0_8, %c0_9, %c0_10] : memref<1x2x128xf32, #tpu.memory_space<vmem>>, vector<1x1x128xf32>
    %16 = vector.shape_cast %15 : vector<1x1x128xf32> to vector<1x128xf32>
    %17 = vector.shape_cast %14 : vector<1x128xf32> to vector<1x1x128xf32>
    tpu.vector_store %arg4[%c0_8, %c0_9, %c0_10], %17 {strides = array<i32>} : memref<1x2x128xf32, #tpu.memory_space<vmem>>, vector<1x1x128xf32>,
    %18 = arith.mulf %12, %12 : vector<128x128xf32>
    %cst_11 = arith.constant dense<0.000000e+00> : vector<128xf32>
    %19 = vector.multi_reduction <add>, %18, %cst_11 [0] : vector<128x128xf32> to vector<128xf32>
    %20 = vector.shape_cast %19 : vector<128xf32> to vector<1x128xf32>
    %c0_12 = arith.constant 0 : index
    %c1 = arith.constant 1 : index
    %c0_13 = arith.constant 0 : index
    %21 = vector.load %arg4[%c0_12, %c1, %c0_13] : memref<1x2x128xf32, #tpu.memory_space<vmem>>, vector<1x1x128xf32>
    %22 = vector.shape_cast %21 : vector<1x1x128xf32> to vector<1x128xf32>
    %23 = vector.shape_cast %20 : vector<1x128xf32> to vector<1x1x128xf32>
    tpu.vector_store %arg4[%c0_12, %c1, %c0_13], %23 {strides = array<i32>} : memref<1x2x128xf32, #tpu.memory_space<vmem>>, vector<1x1x128xf32>,
    return
  }
  func.func @transform_0(%arg0: i32) -> (i32, i32) {
    %c0_i32 = arith.constant 0 : i32
    %c0_i32_0 = arith.constant 0 : i32
    return %arg0, %c0_i32 : i32, i32
  }
  func.func @transform_1(%arg0: i32) -> (i32, i32) {
    %c0_i32 = arith.constant 0 : i32
    %c0_i32_0 = arith.constant 0 : i32
    %c0_i32_1 = arith.constant 0 : i32
    return %c0_i32, %c0_i32_0 : i32, i32
  }
  func.func @transform_2(%arg0: i32) -> (i32, i32) {
    %c0_i32 = arith.constant 0 : i32
    %c0_i32_0 = arith.constant 0 : i32
    return %arg0, %c0_i32 : i32, i32
  }
  func.func @transform_3(%arg0: i32) -> (i32, i32, i32) {
    %c0_i32 = arith.constant 0 : i32
    %c0_i32_0 = arith.constant 0 : i32
    %c0_i32_1 = arith.constant 0 : i32
    return %arg0, %c0_i32, %c0_i32_0 : i32, i32, i32
  }
}

module attributes {stable_mosaic.version = 11 : i64} {
  func.func @_bn_leaky_kernel(%arg0: i32, %arg1: memref<128x128xbf16, #tpu.memory_space<vmem>>, %arg2: memref<1x128xf32, #tpu.memory_space<vmem>>, %arg3: memref<1x128xf32, #tpu.memory_space<vmem>>, %arg4: memref<128x128xbf16, #tpu.memory_space<vmem>>) attributes {dimension_semantics = [#tpu.dimension_semantics<parallel>], iteration_bounds = array<i64: 1>, scalar_prefetch = 0 : i64, scratch_operands = 0 : i64, tpu.core_type = #tpu.core_type<tc>, window_params = [{transform_indices = @transform_0, window_bounds = array<i64: 128, 128>}, {pipeline_mode = #tpu.pipeline_mode<synchronous>, transform_indices = @transform_1, window_bounds = array<i64: 1, 128>}, {pipeline_mode = #tpu.pipeline_mode<synchronous>, transform_indices = @transform_2, window_bounds = array<i64: 1, 128>}, {transform_indices = @transform_3, window_bounds = array<i64: 128, 128>}]} {
    %c0 = arith.constant 0 : index
    %c0_0 = arith.constant 0 : index
    %0 = vector.load %arg1[%c0, %c0_0] : memref<128x128xbf16, #tpu.memory_space<vmem>>, vector<128x128xbf16>
    %1 = arith.extf %0 : vector<128x128xbf16> to vector<128x128xf32>
    %c0_1 = arith.constant 0 : index
    %c0_2 = arith.constant 0 : index
    %2 = vector.load %arg2[%c0_1, %c0_2] : memref<1x128xf32, #tpu.memory_space<vmem>>, vector<1x128xf32>
    %3 = vector.broadcast %2 : vector<1x128xf32> to vector<128x128xf32>
    %4 = arith.mulf %1, %3 : vector<128x128xf32>
    %c0_3 = arith.constant 0 : index
    %c0_4 = arith.constant 0 : index
    %5 = vector.load %arg3[%c0_3, %c0_4] : memref<1x128xf32, #tpu.memory_space<vmem>>, vector<1x128xf32>
    %6 = vector.broadcast %5 : vector<1x128xf32> to vector<128x128xf32>
    %7 = arith.addf %4, %6 : vector<128x128xf32>
    %cst = arith.constant 0.000000e+00 : f32
    %8 = vector.broadcast %cst : f32 to vector<128x128xf32>
    %9 = arith.cmpf oge, %7, %8 : vector<128x128xf32>
    %cst_5 = arith.constant 0.00999999977 : f32
    %10 = vector.broadcast %cst_5 : f32 to vector<128x128xf32>
    %11 = arith.mulf %10, %7 : vector<128x128xf32>
    %12 = arith.select %9, %7, %11 : vector<128x128xi1>, vector<128x128xf32>
    %13 = arith.truncf %12 : vector<128x128xf32> to vector<128x128xbf16>
    %c0_6 = arith.constant 0 : index
    %c0_7 = arith.constant 0 : index
    %14 = vector.load %arg4[%c0_6, %c0_7] : memref<128x128xbf16, #tpu.memory_space<vmem>>, vector<128x128xbf16>
    tpu.vector_store %arg4[%c0_6, %c0_7], %13 {strides = array<i32>} : memref<128x128xbf16, #tpu.memory_space<vmem>>, vector<128x128xbf16>,
    return
  }
  func.func @transform_0(%arg0: i32) -> (i32, i32) {
    %c0_i32 = arith.constant 0 : i32
    %c0_i32_0 = arith.constant 0 : i32
    return %arg0, %c0_i32 : i32, i32
  }
  func.func @transform_1(%arg0: i32) -> (i32, i32) {
    %c0_i32 = arith.constant 0 : i32
    %c0_i32_0 = arith.constant 0 : i32
    %c0_i32_1 = arith.constant 0 : i32
    return %c0_i32, %c0_i32_0 : i32, i32
  }
  func.func @transform_2(%arg0: i32) -> (i32, i32) {
    %c0_i32 = arith.constant 0 : i32
    %c0_i32_0 = arith.constant 0 : i32
    %c0_i32_1 = arith.constant 0 : i32
    return %c0_i32, %c0_i32_0 : i32, i32
  }
  func.func @transform_3(%arg0: i32) -> (i32, i32) {
    %c0_i32 = arith.constant 0 : i32
    %c0_i32_0 = arith.constant 0 : i32
    return %arg0, %c0_i32 : i32, i32
  }
}

module attributes {stable_mosaic.version = 11 : i64} {
  func.func @kernel(%arg0: i32, %arg1: memref<128x256xbf16, #tpu.memory_space<vmem>>, %arg2: memref<256x128xbf16, #tpu.memory_space<vmem>>, %arg3: memref<128x128xbf16, #tpu.memory_space<vmem>>, %arg4: memref<1x2x128xf32, #tpu.memory_space<vmem>>) attributes {dimension_semantics = [#tpu.dimension_semantics<parallel>], iteration_bounds = array<i64: 1>, scalar_prefetch = 0 : i64, scratch_operands = 0 : i64, tpu.core_type = #tpu.core_type<tc>, window_params = [{transform_indices = @transform_0, window_bounds = array<i64: 128, 256>}, {pipeline_mode = #tpu.pipeline_mode<synchronous>, transform_indices = @transform_1, window_bounds = array<i64: 256, 128>}, {transform_indices = @transform_2, window_bounds = array<i64: 128, 128>}, {transform_indices = @transform_3, window_bounds = array<i64: 1, 2, 128>}]} {
    %c0 = arith.constant 0 : index
    %c0_0 = arith.constant 0 : index
    %0 = vector.load %arg1[%c0, %c0_0] : memref<128x256xbf16, #tpu.memory_space<vmem>>, vector<128x256xbf16>
    %c0_1 = arith.constant 0 : index
    %c0_2 = arith.constant 0 : index
    %1 = vector.load %arg2[%c0_1, %c0_2] : memref<256x128xbf16, #tpu.memory_space<vmem>>, vector<256x128xbf16>
    %cst = arith.constant dense<0.000000e+00> : vector<128x128xf32>
    %2 = tpu.matmul %0, %1, %cst {dimension_numbers = #tpu.dot_dimension_numbers<[1], [0], [0], [1], [0, 0, 1, 1], [], []>} : vector<128x256xbf16>, vector<256x128xbf16>, vector<128x128xf32> -> vector<128x128xf32>
    %3 = arith.truncf %2 : vector<128x128xf32> to vector<128x128xbf16>
    %c0_3 = arith.constant 0 : index
    %c0_4 = arith.constant 0 : index
    %4 = vector.load %arg3[%c0_3, %c0_4] : memref<128x128xbf16, #tpu.memory_space<vmem>>, vector<128x128xbf16>
    tpu.vector_store %arg3[%c0_3, %c0_4], %3 {strides = array<i32>} : memref<128x128xbf16, #tpu.memory_space<vmem>>, vector<128x128xbf16>,
    %5 = tpu.iota {dimensions = array<i32: 0>} : vector<128x128xi32>
    %c128_i32 = arith.constant 128 : i32
    %6 = arith.muli %arg0, %c128_i32 : i32
    %7 = vector.broadcast %6 : i32 to vector<128x128xi32>
    %8 = arith.addi %5, %7 : vector<128x128xi32>
    %c128_i32_5 = arith.constant 128 : i32
    %9 = vector.broadcast %c128_i32_5 : i32 to vector<128x128xi32>
    %10 = arith.cmpi slt, %8, %9 : vector<128x128xi32>
    %cst_6 = arith.constant 0.000000e+00 : f32
    %11 = vector.broadcast %cst_6 : f32 to vector<128x128xf32>
    %12 = arith.select %10, %2, %11 : vector<128x128xi1>, vector<128x128xf32>
    %cst_7 = arith.constant dense<0.000000e+00> : vector<128xf32>
    %13 = vector.multi_reduction <add>, %12, %cst_7 [0] : vector<128x128xf32> to vector<128xf32>
    %14 = vector.shape_cast %13 : vector<128xf32> to vector<1x128xf32>
    %c0_8 = arith.constant 0 : index
    %c0_9 = arith.constant 0 : index
    %c0_10 = arith.constant 0 : index
    %15 = vector.load %arg4[%c0_8, %c0_9, %c0_10] : memref<1x2x128xf32, #tpu.memory_space<vmem>>, vector<1x1x128xf32>
    %16 = vector.shape_cast %15 : vector<1x1x128xf32> to vector<1x128xf32>
    %17 = vector.shape_cast %14 : vector<1x128xf32> to vector<1x1x128xf32>
    tpu.vector_store %arg4[%c0_8, %c0_9, %c0_10], %17 {strides = array<i32>} : memref<1x2x128xf32, #tpu.memory_space<vmem>>, vector<1x1x128xf32>,
    %18 = arith.mulf %12, %12 : vector<128x128xf32>
    %cst_11 = arith.constant dense<0.000000e+00> : vector<128xf32>
    %19 = vector.multi_reduction <add>, %18, %cst_11 [0] : vector<128x128xf32> to vector<128xf32>
    %20 = vector.shape_cast %19 : vector<128xf32> to vector<1x128xf32>
    %c0_12 = arith.constant 0 : index
    %c1 = arith.constant 1 : index
    %c0_13 = arith.constant 0 : index
    %21 = vector.load %arg4[%c0_12, %c1, %c0_13] : memref<1x2x128xf32, #tpu.memory_space<vmem>>, vector<1x1x128xf32>
    %22 = vector.shape_cast %21 : vector<1x1x128xf32> to vector<1x128xf32>
    %23 = vector.shape_cast %20 : vector<1x128xf32> to vector<1x1x128xf32>
    tpu.vector_store %arg4[%c0_12, %c1, %c0_13], %23 {strides = array<i32>} : memref<1x2x128xf32, #tpu.memory_space<vmem>>, vector<1x1x128xf32>,
    return
  }
  func.func @transform_0(%arg0: i32) -> (i32, i32) {
    %c0_i32 = arith.constant 0 : i32
    %c0_i32_0 = arith.constant 0 : i32
    return %arg0, %c0_i32 : i32, i32
  }
  func.func @transform_1(%arg0: i32) -> (i32, i32) {
    %c0_i32 = arith.constant 0 : i32
    %c0_i32_0 = arith.constant 0 : i32
    %c0_i32_1 = arith.constant 0 : i32
    return %c0_i32, %c0_i32_0 : i32, i32
  }
  func.func @transform_2(%arg0: i32) -> (i32, i32) {
    %c0_i32 = arith.constant 0 : i32
    %c0_i32_0 = arith.constant 0 : i32
    return %arg0, %c0_i32 : i32, i32
  }
  func.func @transform_3(%arg0: i32) -> (i32, i32, i32) {
    %c0_i32 = arith.constant 0 : i32
    %c0_i32_0 = arith.constant 0 : i32
    %c0_i32_1 = arith.constant 0 : i32
    return %arg0, %c0_i32, %c0_i32_0 : i32, i32, i32
  }
}

module attributes {stable_mosaic.version = 11 : i64} {
  func.func @_bn_leaky_kernel(%arg0: i32, %arg1: memref<128x128xbf16, #tpu.memory_space<vmem>>, %arg2: memref<1x128xf32, #tpu.memory_space<vmem>>, %arg3: memref<1x128xf32, #tpu.memory_space<vmem>>, %arg4: memref<128x128xf32, #tpu.memory_space<vmem>>) attributes {dimension_semantics = [#tpu.dimension_semantics<parallel>], iteration_bounds = array<i64: 1>, scalar_prefetch = 0 : i64, scratch_operands = 0 : i64, tpu.core_type = #tpu.core_type<tc>, window_params = [{transform_indices = @transform_0, window_bounds = array<i64: 128, 128>}, {pipeline_mode = #tpu.pipeline_mode<synchronous>, transform_indices = @transform_1, window_bounds = array<i64: 1, 128>}, {pipeline_mode = #tpu.pipeline_mode<synchronous>, transform_indices = @transform_2, window_bounds = array<i64: 1, 128>}, {transform_indices = @transform_3, window_bounds = array<i64: 128, 128>}]} {
    %c0 = arith.constant 0 : index
    %c0_0 = arith.constant 0 : index
    %0 = vector.load %arg1[%c0, %c0_0] : memref<128x128xbf16, #tpu.memory_space<vmem>>, vector<128x128xbf16>
    %1 = arith.extf %0 : vector<128x128xbf16> to vector<128x128xf32>
    %c0_1 = arith.constant 0 : index
    %c0_2 = arith.constant 0 : index
    %2 = vector.load %arg2[%c0_1, %c0_2] : memref<1x128xf32, #tpu.memory_space<vmem>>, vector<1x128xf32>
    %3 = vector.broadcast %2 : vector<1x128xf32> to vector<128x128xf32>
    %4 = arith.mulf %1, %3 : vector<128x128xf32>
    %c0_3 = arith.constant 0 : index
    %c0_4 = arith.constant 0 : index
    %5 = vector.load %arg3[%c0_3, %c0_4] : memref<1x128xf32, #tpu.memory_space<vmem>>, vector<1x128xf32>
    %6 = vector.broadcast %5 : vector<1x128xf32> to vector<128x128xf32>
    %7 = arith.addf %4, %6 : vector<128x128xf32>
    %cst = arith.constant 0.000000e+00 : f32
    %8 = vector.broadcast %cst : f32 to vector<128x128xf32>
    %9 = arith.cmpf oge, %7, %8 : vector<128x128xf32>
    %cst_5 = arith.constant 0.00999999977 : f32
    %10 = vector.broadcast %cst_5 : f32 to vector<128x128xf32>
    %11 = arith.mulf %10, %7 : vector<128x128xf32>
    %12 = arith.select %9, %7, %11 : vector<128x128xi1>, vector<128x128xf32>
    %c0_6 = arith.constant 0 : index
    %c0_7 = arith.constant 0 : index
    %13 = vector.load %arg4[%c0_6, %c0_7] : memref<128x128xf32, #tpu.memory_space<vmem>>, vector<128x128xf32>
    tpu.vector_store %arg4[%c0_6, %c0_7], %12 {strides = array<i32>} : memref<128x128xf32, #tpu.memory_space<vmem>>, vector<128x128xf32>,
    return
  }
  func.func @transform_0(%arg0: i32) -> (i32, i32) {
    %c0_i32 = arith.constant 0 : i32
    %c0_i32_0 = arith.constant 0 : i32
    return %arg0, %c0_i32 : i32, i32
  }
  func.func @transform_1(%arg0: i32) -> (i32, i32) {
    %c0_i32 = arith.constant 0 : i32
    %c0_i32_0 = arith.constant 0 : i32
    %c0_i32_1 = arith.constant 0 : i32
    return %c0_i32, %c0_i32_0 : i32, i32
  }
  func.func @transform_2(%arg0: i32) -> (i32, i32) {
    %c0_i32 = arith.constant 0 : i32
    %c0_i32_0 = arith.constant 0 : i32
    %c0_i32_1 = arith.constant 0 : i32
    return %c0_i32, %c0_i32_0 : i32, i32
  }
  func.func @transform_3(%arg0: i32) -> (i32, i32) {
    %c0_i32 = arith.constant 0 : i32
    %c0_i32_0 = arith.constant 0 : i32
    return %arg0, %c0_i32 : i32, i32
  }
}

</mosaic_0001>

<bundles_post_ra>
// kernel: conv2x_forward.5
= control target key start
LH: loop header
LB: loop body
LE: loop exit
PB: predicated region body
PF: predicated region fallthrough
CT: control target
= control target key end

     0   :  { %s368_s0 = inlined_call_operand.vmem [shape: bf16[128,128], index: 0, kind: input, shape index: {}]   ;;  %s369_s1 = inlined_call_operand.vmem [shape: f32[1,128], index: 1, kind: input, shape index: {}]   ;;  %s370_s2 = inlined_call_operand.vmem [shape: f32[1,128], index: 2, kind: input, shape index: {}]   ;;  %s371_s3 = inlined_call_operand.vmem [shape: bf16[128,128], index: 3, kind: output, shape index: {}]  }
   0x1   :  { %v171_v0 = vld [vmem:[%s368_s0] sm:$0xff]   ;;  %v242_v5 = vld [vmem:[%s368_s0 + $0x8] sm:$0xff]   ;;  %v243_v8 = vld [vmem:[%s368_s0 + $0x10] sm:$0xff]  }
   0x2   :  { %v284_v1 = vld [vmem:[%s369_s1] ss:$0 sm:$0xff]  ;;  %v172_v2 = vunpack.c.l.bf16 %v171_v0  ;;  %v173_v3 = vunpack.c.h.bf16 %v171_v0  ;;  %v176_v6 = vunpack.c.l.bf16 %v242_v5  ;;  %v177_v7 = vunpack.c.h.bf16 %v242_v5  ;;  %v244_v9 = vld [vmem:[%s368_s0 + $0x18] sm:$0xff]   ;;  %v246_v39 = vld [vmem:[%s368_s0 + $0x28] sm:$0xff]  }
   0x3   :  { %v289_v4 = vld [vmem:[%s370_s2] ss:$0 sm:$0xff]  ;;  %v180_v12 = vunpack.c.l.bf16 %v243_v8  ;;  %v181_v13 = vunpack.c.h.bf16 %v243_v8  ;;  %v184_v16 = vunpack.c.l.bf16 %v244_v9  ;;  %v185_v17 = vunpack.c.h.bf16 %v244_v9  ;;  %v247_v49 = vld [vmem:[%s368_s0 + $0x30] sm:$0xff]   ;;  %v248_v57 = vld [vmem:[%s368_s0 + $0x38] sm:$0xff]  }
   0x4   :  { %v50_v10 = vmul.f32 %v284_v1, %v172_v2  ;;  %v51_v11 = vmul.f32 %v284_v1, %v173_v3  ;;  %v52_v14 = vmul.f32 %v284_v1, %v176_v6  ;;  %v53_v15 = vmul.f32 %v284_v1, %v177_v7  ;;  %v245_v38 = vld [vmem:[%s368_s0 + $0x20] sm:$0xff]  }
   0x5   :  { %v54_v20 = vmul.f32 %v284_v1, %v180_v12  ;;  %v55_v21 = vmul.f32 %v284_v1, %v181_v13  ;;  %v56_v24 = vmul.f32 %v284_v1, %v184_v16  ;;  %v57_v25 = vmul.f32 %v284_v1, %v185_v17 }
   0x6   :  { %v70_v18 = vadd.f32 %v289_v4, %v50_v10  ;;  %v71_v19 = vadd.f32 %v289_v4, %v51_v11  ;;  %v72_v22 = vadd.f32 %v289_v4, %v52_v14  ;;  %v73_v23 = vadd.f32 %v289_v4, %v53_v15 }
   0x7   :  { %v74_v32 = vadd.f32 %v289_v4, %v54_v20  ;;  %v75_v33 = vadd.f32 %v289_v4, %v55_v21  ;;  %v76_v37 = vadd.f32 %v289_v4, %v56_v24  ;;  %v77_v43 = vadd.f32 %v289_v4, %v57_v25 }
   0x8   :  { %vm86_vm0 = vcmp.ge.f32.partialorder %v70_v18, 0.0  ;;  %vm87_vm1 = vcmp.ge.f32.partialorder %v71_v19, 0.0  ;;  %v102_v26 = vmul.f32 0.01, %v70_v18  ;;  %v103_v27 = vmul.f32 0.01, %v71_v19 }
   0x9   :  { %vm88_vm2 = vcmp.ge.f32.partialorder %v72_v22, 0.0  ;;  %vm89_vm3 = vcmp.ge.f32.partialorder %v73_v23, 0.0  ;;  %v104_v28 = vmul.f32 0.01, %v72_v22  ;;  %v105_v29 = vmul.f32 0.01, %v73_v23 }
   0xa   :  { %v118_v30 = vsel %vm86_vm0, %v70_v18, %v102_v26  ;;  %v119_v31 = vsel %vm87_vm1, %v71_v19, %v103_v27  ;;  %vm90_vm4 = vcmp.ge.f32.partialorder %v74_v32, 0.0  ;;  %vm91_vm5 = vcmp.ge.f32.partialorder %v75_v33, 0.0 }
   0xb   :  { %v205_v34 = vpack.c.bf16 %v119_v31, %v118_v30  ;;  %v120_v35 = vsel %vm88_vm2, %v72_v22, %v104_v28  ;;  %v121_v36 = vsel %vm89_vm3, %v73_v23, %v105_v29  ;;  %v106_v41 = vmul.f32 0.01, %v74_v32 }
   0xc   :  { %v210_v40 = vpack.c.bf16 %v121_v36, %v120_v35  ;;  %v107_v42 = vmul.f32 0.01, %v75_v33  ;;  %vm92_vm6 = vcmp.ge.f32.partialorder %v76_v37, 0.0  ;;  %v108_v44 = vmul.f32 0.01, %v76_v37 }
   0xd   :  { %206 = vst [vmem:[%s371_s3] sm:$0xff] %v205_v34   ;;  %v122_v45 = vsel %vm90_vm4, %v74_v32, %v106_v41  ;;  %v188_v46 = vunpack.c.l.bf16 %v245_v38  ;;  %v189_v47 = vunpack.c.h.bf16 %v245_v38  ;;  %v192_v48 = vunpack.c.l.bf16 %v246_v39 }
   0xe   :  { %249 = vst [vmem:[%s371_s3 + $0x8] sm:$0xff] %v210_v40   ;;  %v123_v50 = vsel %vm91_vm5, %v75_v33, %v107_v42  ;;  %vm93_vm7 = vcmp.ge.f32.partialorder %v77_v43, 0.0  ;;  %v109_v51 = vmul.f32 0.01, %v77_v43  ;;  %v124_v52 = vsel %vm92_vm6, %v76_v37, %v108_v44 }
   0xf   :  { %v215_v53 = vpack.c.bf16 %v123_v50, %v122_v45  ;;  %v58_v54 = vmul.f32 %v284_v1, %v188_v46  ;;  %v59_v55 = vmul.f32 %v284_v1, %v189_v47  ;;  %v193_v56 = vunpack.c.h.bf16 %v246_v39 }
  0x10   :  { %v125_v58 = vsel %vm93_vm7, %v77_v43, %v109_v51  ;;  %v60_v59 = vmul.f32 %v284_v1, %v192_v48  ;;  %v196_v60 = vunpack.c.l.bf16 %v247_v49  ;;  %v197_v61 = vunpack.c.h.bf16 %v247_v49 }
  0x11   :  { %250 = vst [vmem:[%s371_s3 + $0x10] sm:$0xff] %v215_v53   ;;  %v220_v62 = vpack.c.bf16 %v125_v58, %v124_v52  ;;  %v78_v63 = vadd.f32 %v289_v4, %v58_v54  ;;  %v79_v0 = vadd.f32 %v289_v4, %v59_v55  ;;  %v61_v2 = vmul.f32 %v284_v1, %v193_v56 }
  0x12   :  { %v80_v3 = vadd.f32 %v289_v4, %v60_v59  ;;  %v62_v5 = vmul.f32 %v284_v1, %v196_v60  ;;  %v63_v6 = vmul.f32 %v284_v1, %v197_v61  ;;  %v200_v7 = vunpack.c.l.bf16 %v248_v57 }
  0x13   :  { %251 = vst [vmem:[%s371_s3 + $0x18] sm:$0xff] %v220_v62   ;;  %vm94_vm8 = vcmp.ge.f32.partialorder %v78_v63, 0.0  ;;  %vm95_vm9 = vcmp.ge.f32.partialorder %v79_v0, 0.0  ;;  %v110_v8 = vmul.f32 0.01, %v78_v63  ;;  %v81_v9 = vadd.f32 %v289_v4, %v61_v2 }
  0x14   :  { %v111_v10 = vmul.f32 0.01, %v79_v0  ;;  %vm96_vm10 = vcmp.ge.f32.partialorder %v80_v3, 0.0  ;;  %v112_v11 = vmul.f32 0.01, %v80_v3  ;;  %v82_v12 = vadd.f32 %v289_v4, %v62_v5 }
  0x15   :  { %v126_v13 = vsel %vm94_vm8, %v78_v63, %v110_v8  ;;  %vm97_vm11 = vcmp.ge.f32.partialorder %v81_v9, 0.0  ;;  %v113_v14 = vmul.f32 0.01, %v81_v9  ;;  %v83_v15 = vadd.f32 %v289_v4, %v63_v6 }
  0x16   :  { %v127_v16 = vsel %vm95_vm9, %v79_v0, %v111_v10  ;;  %v128_v17 = vsel %vm96_vm10, %v80_v3, %v112_v11  ;;  %vm98_vm12 = vcmp.ge.f32.partialorder %v82_v12, 0.0  ;;  %v114_v18 = vmul.f32 0.01, %v82_v12 }
  0x17   :  { %v225_v19 = vpack.c.bf16 %v127_v16, %v126_v13  ;;  %v129_v20 = vsel %vm97_vm11, %v81_v9, %v113_v14  ;;  %vm99_vm13 = vcmp.ge.f32.partialorder %v83_v15, 0.0  ;;  %v115_v21 = vmul.f32 0.01, %v83_v15 }
  0x18   :  { %v230_v22 = vpack.c.bf16 %v129_v20, %v128_v17  ;;  %v130_v23 = vsel %vm98_vm12, %v82_v12, %v114_v18  ;;  %v201_v24 = vunpack.c.h.bf16 %v248_v57  ;;  %v64_v25 = vmul.f32 %v284_v1, %v200_v7 }
  0x19   :  { %252 = vst [vmem:[%s371_s3 + $0x20] sm:$0xff] %v225_v19   ;;  %v131_v26 = vsel %vm99_vm13, %v83_v15, %v115_v21 }
  0x1a   :  { %253 = vst [vmem:[%s371_s3 + $0x28] sm:$0xff] %v230_v22   ;;  %v235_v27 = vpack.c.bf16 %v131_v26, %v130_v23  ;;  %v65_v28 = vmul.f32 %v284_v1, %v201_v24  ;;  %v84_v29 = vadd.f32 %v289_v4, %v64_v25 }
  0x1c   :  { %254 = vst [vmem:[%s371_s3 + $0x30] sm:$0xff] %v235_v27   ;;  %v85_v30 = vadd.f32 %v289_v4, %v65_v28  ;;  %vm100_vm14 = vcmp.ge.f32.partialorder %v84_v29, 0.0  ;;  %v116_v31 = vmul.f32 0.01, %v84_v29 }
  0x1e   :  { %vm101_vm15 = vcmp.ge.f32.partialorder %v85_v30, 0.0  ;;  %v117_v32 = vmul.f32 0.01, %v85_v30  ;;  %v132_v33 = vsel %vm100_vm14, %v84_v29, %v116_v31 }
  0x20   :  { %v133_v34 = vsel %vm101_vm15, %v85_v30, %v117_v32 }
  0x21   :  { %v240_v35 = vpack.c.bf16 %v133_v34, %v132_v33 }
  0x23   :  { %255 = vst [vmem:[%s371_s3 + $0x38] sm:$0xff] %v240_v35  }

// kernel: conv2x_forward.4
= control target key start
LH: loop header
LB: loop body
LE: loop exit
PB: predicated region body
PF: predicated region fallthrough
CT: control target
= control target key end

     0   :  { %s612_s1 = inlined_call_operand.vmem [shape: bf16[128,128], index: 1, kind: input, shape index: {}]   ;;  %s613_s0 = inlined_call_operand.vmem [shape: bf16[128,128], index: 0, kind: input, shape index: {}]   ;;  %s614_s2 = inlined_call_operand.vmem [shape: bf16[128,128], index: 2, kind: output, shape index: {0}]   ;;  %s615_s3 = inlined_call_operand.vmem [shape: f32[1,2,128], index: 3, kind: output, shape index: {1}]  }
   0x1   :  { %v436_v0 = vld [vmem:[%s612_s1 + $0x38] sm:$0xff]  ;;  %v435_v1 = vld [vmem:[%s612_s1 + $0x30] sm:$0xff]  ;;  %v434_v2 = vld [vmem:[%s612_s1 + $0x28] sm:$0xff] }
   0x2   :  { %141 = vmatpush.bf16.msra.mxu0 %v436_v0  ;;  %484 = vmatpush.bf16.msra.mxu1 %v436_v0  ;;  %v433_v3 = vld [vmem:[%s612_s1 + $0x20] sm:$0xff]  ;;  %v432_v4 = vld [vmem:[%s612_s1 + $0x18] sm:$0xff]  ;;  %v431_v5 = vld [vmem:[%s612_s1 + $0x10] sm:$0xff] }
   0x3   :  { %485 = vmatpush.bf16.msra.mxu2 %v436_v0  ;;  %486 = vmatpush.bf16.msra.mxu3 %v436_v0  ;;  %v430_v6 = vld [vmem:[%s612_s1 + $0x8] sm:$0xff]  ;;  %v429_v7 = vld [vmem:[%s612_s1] sm:$0xff]  ;;  %v423_v9 = vld [vmem:[%s613_s0 + $0x10] sm:$0xff] }
   0x4   :  { %v421_v8 = vld [vmem:[%s613_s0] sm:$0xff]  ;;  %v427_v11 = vld [vmem:[%s613_s0 + $0x30] sm:$0xff]  ;;  %v422_v12 = vld [vmem:[%s613_s0 + $0x8] sm:$0xff] }
   0x5   :  { %v425_v10 = vld [vmem:[%s613_s0 + $0x20] sm:$0xff]  ;;  %v424_v13 = vld [vmem:[%s613_s0 + $0x18] sm:$0xff]  ;;  %v426_v14 = vld [vmem:[%s613_s0 + $0x28] sm:$0xff] }
   0x6   :  { %142 = vmatpush.bf16.msra.mxu0 %v435_v1  ;;  %487 = vmatpush.bf16.msra.mxu1 %v435_v1  ;;  %v428_v15 = vld [vmem:[%s613_s0 + $0x38] sm:$0xff] }
   0x7   :  { %488 = vmatpush.bf16.msra.mxu2 %v435_v1  ;;  %489 = vmatpush.bf16.msra.mxu3 %v435_v1 }
   0xa   :  { %143 = vmatpush.bf16.msra.mxu0 %v434_v2  ;;  %490 = vmatpush.bf16.msra.mxu1 %v434_v2 }
   0xb   :  { %491 = vmatpush.bf16.msra.mxu2 %v434_v2  ;;  %492 = vmatpush.bf16.msra.mxu3 %v434_v2 }
   0xe   :  { %144 = vmatpush.bf16.msra.mxu0 %v433_v3  ;;  %493 = vmatpush.bf16.msra.mxu1 %v433_v3 }
   0xf   :  { %494 = vmatpush.bf16.msra.mxu2 %v433_v3  ;;  %495 = vmatpush.bf16.msra.mxu3 %v433_v3 }
  0x12   :  { %145 = vmatpush.bf16.msra.mxu0 %v432_v4  ;;  %496 = vmatpush.bf16.msra.mxu1 %v432_v4 }
  0x13   :  { %497 = vmatpush.bf16.msra.mxu2 %v432_v4  ;;  %498 = vmatpush.bf16.msra.mxu3 %v432_v4 }
  0x16   :  { %146 = vmatpush.bf16.msra.mxu0 %v431_v5  ;;  %499 = vmatpush.bf16.msra.mxu1 %v431_v5 }
  0x17   :  { %500 = vmatpush.bf16.msra.mxu2 %v431_v5  ;;  %501 = vmatpush.bf16.msra.mxu3 %v431_v5 }
  0x1a   :  { %147 = vmatpush.bf16.msra.mxu0 %v430_v6  ;;  %502 = vmatpush.bf16.msra.mxu1 %v430_v6 }
  0x1b   :  { %503 = vmatpush.bf16.msra.mxu2 %v430_v6  ;;  %504 = vmatpush.bf16.msra.mxu3 %v430_v6 }
  0x1e   :  { %148 = vmatpush.bf16.msra.mxu0 %v429_v7  ;;  %505 = vmatpush.bf16.msra.mxu1 %v429_v7 }
  0x1f   :  { %506 = vmatpush.bf16.msra.mxu2 %v429_v7  ;;  %507 = vmatpush.bf16.msra.mxu3 %v429_v7 }
  0x21   :  { %149 = vmatmul.bf16.vlgmr.msra.gmra.mxu0 %v421_v8  ;;  %159 = vmatmul.bf16.vlgmr.msra.gmra.mxu1 %v423_v9 }
  0x22   :  { %169 = vmatmul.bf16.vlgmr.msra.gmra.mxu2 %v425_v10  ;;  %179 = vmatmul.bf16.vlgmr.msra.gmra.mxu3 %v427_v11 }
  0x31   :  { %154 = vmatmul.bf16.gmra.mxu0 %v422_v12  ;;  %164 = vmatmul.bf16.gmra.mxu1 %v424_v13 }
  0x32   :  { %174 = vmatmul.bf16.gmra.mxu2 %v426_v14  ;;  %184 = vmatmul.bf16.gmra.mxu3 %v428_v15 }
  0x9e   :  { %v150_v16 = vpop.f32.mrf.mxu0  ;;  %v160_v17 = vpop.f32.mrf.mxu1 }
  0x9f   :  { %v311_v31 = vmul.f32 %v150_v16, %v150_v16  ;;  %v315_v45 = vmul.f32 %v160_v17, %v160_v17 }
  0xa5   :  { %v170_v18 = vpop.f32.mrf.mxu2  ;;  %v576_v19 = vpop.f32.mrf.mxu3 }
  0xa6   :  { %v152_v20 = vpop.f32.mrf.mxu0  ;;  %v162_v21 = vpop.f32.mrf.mxu1  ;;  %v319_v61 = vmul.f32 %v170_v18, %v170_v18  ;;  %v323_v9 = vmul.f32 %v576_v19, %v576_v19 }
  0xa7   :  { %v440_v22 = vpack.c.bf16 %v152_v20, %v150_v16  ;;  %v450_v23 = vpack.c.bf16 %v162_v21, %v160_v17  ;;  %v312_v30 = vmul.f32 %v152_v20, %v152_v20  ;;  %v289_v33 = vadd.f32 %v152_v20, %v150_v16 }
  0xa8   :  { %v316_v48 = vmul.f32 %v162_v21, %v162_v21 }
  0xa9   :  { %441 = vst [vmem:[%s614_s2] sm:$0xff] %v440_v22   ;;  %v327_v34 = vadd.f32 %v312_v30, %v311_v31 }
  0xaa   :  { %478 = vst [vmem:[%s614_s2 + $0x10] sm:$0xff] %v450_v23  }
  0xad   :  { %v172_v24 = vpop.f32.mrf.mxu2  ;;  %v182_v25 = vpop.f32.mrf.mxu3 }
  0xae   :  { %v155_v26 = vpop.f32.mrf.mxu0  ;;  %v165_v27 = vpop.f32.mrf.mxu1  ;;  %v460_v28 = vpack.c.bf16 %v172_v24, %v170_v18  ;;  %v470_v29 = vpack.c.bf16 %v182_v25, %v576_v19  ;;  %v320_v0 = vmul.f32 %v172_v24, %v172_v24  ;;  %v324_v12 = vmul.f32 %v182_v25, %v182_v25 }
  0xaf   :  { %v313_v32 = vmul.f32 %v155_v26, %v155_v26  ;;  %v290_v35 = vadd.f32 %v289_v33, %v155_v26  ;;  %v317_v51 = vmul.f32 %v165_v27, %v165_v27 }
  0xb0   :  { %480 = vst [vmem:[%s614_s2 + $0x20] sm:$0xff] %v460_v28  }
  0xb1   :  { %482 = vst [vmem:[%s614_s2 + $0x30] sm:$0xff] %v470_v29   ;;  %v328_v38 = vadd.f32 %v327_v34, %v313_v32 }
  0xb5   :  { %v175_v36 = vpop.f32.mrf.mxu2  ;;  %v185_v37 = vpop.f32.mrf.mxu3 }
  0xb6   :  { %v157_v39 = vpop.f32.mrf.mxu0  ;;  %v167_v40 = vpop.f32.mrf.mxu1  ;;  %v321_v4 = vmul.f32 %v175_v36, %v175_v36  ;;  %v325_v16 = vmul.f32 %v185_v37, %v185_v37 }
  0xb7   :  { %v445_v41 = vpack.c.bf16 %v157_v39, %v155_v26  ;;  %v291_v42 = vadd.f32 %v290_v35, %v157_v39  ;;  %v314_v43 = vmul.f32 %v157_v39, %v157_v39  ;;  %v455_v44 = vpack.c.bf16 %v167_v40, %v165_v27 }
  0xb8   :  { %v318_v59 = vmul.f32 %v167_v40, %v167_v40 }
  0xb9   :  { %477 = vst [vmem:[%s614_s2 + $0x8] sm:$0xff] %v445_v41   ;;  %v292_v46 = vadd.f32 %v291_v42, %v160_v17  ;;  %v329_v47 = vadd.f32 %v328_v38, %v314_v43 }
  0xba   :  { %479 = vst [vmem:[%s614_s2 + $0x18] sm:$0xff] %v455_v44  }
  0xbb   :  { %v330_v49 = vadd.f32 %v329_v47, %v315_v45  ;;  %v293_v50 = vadd.f32 %v292_v46, %v162_v21 }
  0xbd   :  { %v294_v52 = vadd.f32 %v293_v50, %v165_v27  ;;  %v331_v53 = vadd.f32 %v330_v49, %v316_v48  ;;  %v177_v54 = vpop.f32.mrf.mxu2  ;;  %v187_v55 = vpop.f32.mrf.mxu3 }
  0xbe   :  { %v465_v56 = vpack.c.bf16 %v177_v54, %v175_v36  ;;  %v475_v57 = vpack.c.bf16 %v187_v55, %v185_v37  ;;  %v322_v8 = vmul.f32 %v177_v54, %v177_v54  ;;  %v326_v21 = vmul.f32 %v187_v55, %v187_v55 }
  0xbf   :  { %v295_v58 = vadd.f32 %v294_v52, %v167_v40  ;;  %v332_v60 = vadd.f32 %v331_v53, %v317_v51 }
  0xc0   :  { %481 = vst [vmem:[%s614_s2 + $0x28] sm:$0xff] %v465_v56  }
  0xc1   :  { %v296_v62 = vadd.f32 %v295_v58, %v170_v18  ;;  %v333_v63 = vadd.f32 %v332_v60, %v318_v59  ;;  %483 = vst [vmem:[%s614_s2 + $0x38] sm:$0xff] %v475_v57  }
  0xc3   :  { %v334_v1 = vadd.f32 %v333_v63, %v319_v61  ;;  %v297_v2 = vadd.f32 %v296_v62, %v172_v24 }
  0xc5   :  { %v298_v3 = vadd.f32 %v297_v2, %v175_v36  ;;  %v335_v5 = vadd.f32 %v334_v1, %v320_v0 }
  0xc7   :  { %v336_v6 = vadd.f32 %v335_v5, %v321_v4  ;;  %v299_v7 = vadd.f32 %v298_v3, %v177_v54 }
  0xc9   :  { %v300_v10 = vadd.f32 %v299_v7, %v576_v19  ;;  %v337_v11 = vadd.f32 %v336_v6, %v322_v8 }
  0xcb   :  { %v338_v13 = vadd.f32 %v337_v11, %v323_v9  ;;  %v301_v14 = vadd.f32 %v300_v10, %v182_v25 }
  0xcd   :  { %v302_v15 = vadd.f32 %v301_v14, %v185_v37  ;;  %v339_v17 = vadd.f32 %v338_v13, %v324_v12 }
  0xcf   :  { %v340_v18 = vadd.f32 %v339_v17, %v325_v16  ;;  %v303_v20 = vadd.f32 %v302_v15, %v187_v55 }
  0xd1   :  { %v304_v22 = vrot.slane %v303_v20, 4  ;;  %v341_v23 = vadd.f32 %v340_v18, %v326_v21 }
  0xd3   :  { %v305_v24 = vadd.f32 %v304_v22, %v303_v20  ;;  %v342_v26 = vrot.slane %v341_v23, 4 }
  0xd5   :  { %v306_v27 = vrot.slane %v305_v24, 2  ;;  %v343_v28 = vadd.f32 %v342_v26, %v341_v23 }
  0xd7   :  { %v307_v29 = vadd.f32 %v306_v27, %v305_v24  ;;  %v344_v30 = vrot.slane %v343_v28, 2 }
  0xd9   :  { %v308_v31 = vrot.slane %v307_v29, 1  ;;  %v345_v19 = vadd.f32 %v344_v30, %v343_v28 }
  0xdb   :  { %v309_v32 = vadd.f32 %v308_v31, %v307_v29  ;;  %v346_v33 = vrot.slane %v345_v19, 1 }
  0xdd   :  { %310 = vst [vmem:[%s615_s3] sm:$0x1] %v309_v32  ;;  %v347_v25 = vadd.f32 %v346_v33, %v345_v19 }
  0xdf   :  { %348 = vst [vmem:[%s615_s3 + $0x1] sm:$0x1] %v347_v25 }

// kernel: conv2x_forward.7
= control target key start
LH: loop header
LB: loop body
LE: loop exit
PB: predicated region body
PF: predicated region fallthrough
CT: control target
= control target key end

     0   :  { %s329_s0 = inlined_call_operand.vmem [shape: bf16[128,128], index: 0, kind: input, shape index: {}]   ;;  %s330_s1 = inlined_call_operand.vmem [shape: f32[1,128], index: 1, kind: input, shape index: {}]   ;;  %s331_s2 = inlined_call_operand.vmem [shape: f32[1,128], index: 2, kind: input, shape index: {}]   ;;  %s332_s3 = inlined_call_operand.vmem [shape: f32[128,128], index: 3, kind: output, shape index: {}]  }
   0x1   :  { %v155_v0 = vld [vmem:[%s329_s0] sm:$0xff]   ;;  %v186_v5 = vld [vmem:[%s329_s0 + $0x8] sm:$0xff]   ;;  %v187_v8 = vld [vmem:[%s329_s0 + $0x10] sm:$0xff]  }
   0x2   :  { %v221_v1 = vld [vmem:[%s330_s1] ss:$0 sm:$0xff]  ;;  %v156_v2 = vunpack.c.l.bf16 %v155_v0  ;;  %v157_v4 = vunpack.c.h.bf16 %v155_v0  ;;  %v160_v6 = vunpack.c.l.bf16 %v186_v5  ;;  %v161_v7 = vunpack.c.h.bf16 %v186_v5  ;;  %v188_v9 = vld [vmem:[%s329_s0 + $0x18] sm:$0xff]   ;;  %v190_v39 = vld [vmem:[%s329_s0 + $0x28] sm:$0xff]  }
   0x3   :  { %v226_v3 = vld [vmem:[%s331_s2] ss:$0 sm:$0xff]  ;;  %v164_v12 = vunpack.c.l.bf16 %v187_v8  ;;  %v165_v13 = vunpack.c.h.bf16 %v187_v8  ;;  %v168_v16 = vunpack.c.l.bf16 %v188_v9  ;;  %v169_v17 = vunpack.c.h.bf16 %v188_v9  ;;  %v191_v42 = vld [vmem:[%s329_s0 + $0x30] sm:$0xff]   ;;  %v192_v49 = vld [vmem:[%s329_s0 + $0x38] sm:$0xff]  }
   0x4   :  { %v50_v10 = vmul.f32 %v221_v1, %v156_v2  ;;  %v51_v11 = vmul.f32 %v221_v1, %v157_v4  ;;  %v52_v14 = vmul.f32 %v221_v1, %v160_v6  ;;  %v53_v15 = vmul.f32 %v221_v1, %v161_v7  ;;  %v189_v26 = vld [vmem:[%s329_s0 + $0x20] sm:$0xff]  }
   0x5   :  { %v54_v20 = vmul.f32 %v221_v1, %v164_v12  ;;  %v55_v21 = vmul.f32 %v221_v1, %v165_v13  ;;  %v56_v24 = vmul.f32 %v221_v1, %v168_v16  ;;  %v57_v25 = vmul.f32 %v221_v1, %v169_v17 }
   0x6   :  { %v70_v18 = vadd.f32 %v226_v3, %v50_v10  ;;  %v71_v19 = vadd.f32 %v226_v3, %v51_v11  ;;  %v72_v22 = vadd.f32 %v226_v3, %v52_v14  ;;  %v73_v23 = vadd.f32 %v226_v3, %v53_v15 }
   0x7   :  { %v74_v33 = vadd.f32 %v226_v3, %v54_v20  ;;  %v75_v34 = vadd.f32 %v226_v3, %v55_v21  ;;  %v76_v37 = vadd.f32 %v226_v3, %v56_v24  ;;  %v77_v38 = vadd.f32 %v226_v3, %v57_v25 }
   0x8   :  { %vm86_vm0 = vcmp.ge.f32.partialorder %v70_v18, 0.0  ;;  %v102_v27 = vmul.f32 0.01, %v70_v18  ;;  %vm87_vm1 = vcmp.ge.f32.partialorder %v71_v19, 0.0  ;;  %v103_v28 = vmul.f32 0.01, %v71_v19 }
   0x9   :  { %vm88_vm2 = vcmp.ge.f32.partialorder %v72_v22, 0.0  ;;  %v104_v29 = vmul.f32 0.01, %v72_v22  ;;  %vm89_vm3 = vcmp.ge.f32.partialorder %v73_v23, 0.0  ;;  %v105_v30 = vmul.f32 0.01, %v73_v23 }
   0xa   :  { %v118_v31 = vsel %vm86_vm0, %v70_v18, %v102_v27  ;;  %v119_v32 = vsel %vm87_vm1, %v71_v19, %v103_v28  ;;  %vm90_vm4 = vcmp.ge.f32.partialorder %v74_v33, 0.0  ;;  %v106_v40 = vmul.f32 0.01, %v74_v33 }
   0xb   :  { %134 = vst [vmem:[%s332_s3] sm:$0xff] %v118_v31  ;;  %v120_v35 = vsel %vm88_vm2, %v72_v22, %v104_v29  ;;  %v121_v36 = vsel %vm89_vm3, %v73_v23, %v105_v30  ;;  %vm91_vm5 = vcmp.ge.f32.partialorder %v75_v34, 0.0  ;;  %v172_v41 = vunpack.c.l.bf16 %v189_v26 }
   0xc   :  { %135 = vst [vmem:[%s332_s3 + $0x8] sm:$0xff] %v119_v32  ;;  %v107_v43 = vmul.f32 0.01, %v75_v34  ;;  %vm92_vm6 = vcmp.ge.f32.partialorder %v76_v37, 0.0  ;;  %v108_v44 = vmul.f32 0.01, %v76_v37  ;;  %v173_v45 = vunpack.c.h.bf16 %v189_v26 }
   0xd   :  { %136 = vst [vmem:[%s332_s3 + $0x10] sm:$0xff] %v120_v35  ;;  %v122_v46 = vsel %vm90_vm4, %v74_v33, %v106_v40  ;;  %vm93_vm7 = vcmp.ge.f32.partialorder %v77_v38, 0.0  ;;  %v109_v47 = vmul.f32 0.01, %v77_v38  ;;  %v58_v48 = vmul.f32 %v221_v1, %v172_v41 }
   0xe   :  { %137 = vst [vmem:[%s332_s3 + $0x18] sm:$0xff] %v121_v36  ;;  %v123_v50 = vsel %vm91_vm5, %v75_v34, %v107_v43  ;;  %v124_v51 = vsel %vm92_vm6, %v76_v37, %v108_v44  ;;  %v59_v52 = vmul.f32 %v221_v1, %v173_v45  ;;  %v176_v53 = vunpack.c.l.bf16 %v190_v39 }
   0xf   :  { %138 = vst [vmem:[%s332_s3 + $0x20] sm:$0xff] %v122_v46  ;;  %v125_v54 = vsel %vm93_vm7, %v77_v38, %v109_v47  ;;  %v78_v55 = vadd.f32 %v226_v3, %v58_v48  ;;  %v177_v56 = vunpack.c.h.bf16 %v190_v39  ;;  %v180_v57 = vunpack.c.l.bf16 %v191_v42 }
  0x10   :  { %139 = vst [vmem:[%s332_s3 + $0x28] sm:$0xff] %v123_v50  ;;  %v79_v58 = vadd.f32 %v226_v3, %v59_v52  ;;  %v60_v59 = vmul.f32 %v221_v1, %v176_v53  ;;  %v181_v60 = vunpack.c.h.bf16 %v191_v42  ;;  %v184_v61 = vunpack.c.l.bf16 %v192_v49 }
  0x11   :  { %140 = vst [vmem:[%s332_s3 + $0x30] sm:$0xff] %v124_v51  ;;  %vm94_vm8 = vcmp.ge.f32.partialorder %v78_v55, 0.0  ;;  %v110_v62 = vmul.f32 0.01, %v78_v55  ;;  %v61_v63 = vmul.f32 %v221_v1, %v177_v56  ;;  %v62_v0 = vmul.f32 %v221_v1, %v180_v57 }
  0x12   :  { %141 = vst [vmem:[%s332_s3 + $0x38] sm:$0xff] %v125_v54  ;;  %vm95_vm9 = vcmp.ge.f32.partialorder %v79_v58, 0.0  ;;  %v111_v2 = vmul.f32 0.01, %v79_v58  ;;  %v80_v4 = vadd.f32 %v226_v3, %v60_v59  ;;  %v63_v5 = vmul.f32 %v221_v1, %v181_v60 }
  0x13   :  { %v126_v6 = vsel %vm94_vm8, %v78_v55, %v110_v62  ;;  %v81_v7 = vadd.f32 %v226_v3, %v61_v63  ;;  %v82_v8 = vadd.f32 %v226_v3, %v62_v0  ;;  %v64_v9 = vmul.f32 %v221_v1, %v184_v61 }
  0x14   :  { %142 = vst [vmem:[%s332_s3 + $0x40] sm:$0xff] %v126_v6  ;;  %v127_v10 = vsel %vm95_vm9, %v79_v58, %v111_v2  ;;  %vm96_vm10 = vcmp.ge.f32.partialorder %v80_v4, 0.0  ;;  %v112_v11 = vmul.f32 0.01, %v80_v4  ;;  %v83_v12 = vadd.f32 %v226_v3, %v63_v5 }
  0x15   :  { %143 = vst [vmem:[%s332_s3 + $0x48] sm:$0xff] %v127_v10  ;;  %vm97_vm11 = vcmp.ge.f32.partialorder %v81_v7, 0.0  ;;  %v113_v13 = vmul.f32 0.01, %v81_v7  ;;  %vm98_vm12 = vcmp.ge.f32.partialorder %v82_v8, 0.0  ;;  %v84_v14 = vadd.f32 %v226_v3, %v64_v9 }
  0x16   :  { %v128_v15 = vsel %vm96_vm10, %v80_v4, %v112_v11  ;;  %v114_v16 = vmul.f32 0.01, %v82_v8  ;;  %vm99_vm13 = vcmp.ge.f32.partialorder %v83_v12, 0.0  ;;  %v115_v17 = vmul.f32 0.01, %v83_v12 }
  0x17   :  { %144 = vst [vmem:[%s332_s3 + $0x50] sm:$0xff] %v128_v15  ;;  %v129_v18 = vsel %vm97_vm11, %v81_v7, %v113_v13  ;;  %vm100_vm14 = vcmp.ge.f32.partialorder %v84_v14, 0.0  ;;  %v116_v19 = vmul.f32 0.01, %v84_v14  ;;  %v185_v20 = vunpack.c.h.bf16 %v192_v49 }
  0x18   :  { %145 = vst [vmem:[%s332_s3 + $0x58] sm:$0xff] %v129_v18  ;;  %v130_v21 = vsel %vm98_vm12, %v82_v8, %v114_v16  ;;  %v131_v22 = vsel %vm99_vm13, %v83_v12, %v115_v17 }
  0x19   :  { %146 = vst [vmem:[%s332_s3 + $0x60] sm:$0xff] %v130_v21  ;;  %v132_v23 = vsel %vm100_vm14, %v84_v14, %v116_v19  ;;  %v65_v24 = vmul.f32 %v221_v1, %v185_v20 }
  0x1a   :  { %147 = vst [vmem:[%s332_s3 + $0x68] sm:$0xff] %v131_v22 }
  0x1b   :  { %148 = vst [vmem:[%s332_s3 + $0x70] sm:$0xff] %v132_v23  ;;  %v85_v25 = vadd.f32 %v226_v3, %v65_v24 }
  0x1d   :  { %vm101_vm15 = vcmp.ge.f32.partialorder %v85_v25, 0.0  ;;  %v117_v26 = vmul.f32 0.01, %v85_v25 }
  0x1f   :  { %v133_v27 = vsel %vm101_vm15, %v85_v25, %v117_v26 }
  0x20   :  { %149 = vst [vmem:[%s332_s3 + $0x78] sm:$0xff] %v133_v27 }

// kernel: conv2x_forward.6
= control target key start
LH: loop header
LB: loop body
LE: loop exit
PB: predicated region body
PF: predicated region fallthrough
CT: control target
= control target key end

     0   :  { %s943_s1 = inlined_call_operand.vmem [shape: bf16[256,128], index: 1, kind: input, shape index: {}]   ;;  %s944_s0 = inlined_call_operand.vmem [shape: bf16[128,256], index: 0, kind: input, shape index: {}]   ;;  %s945_s2 = inlined_call_operand.vmem [shape: bf16[128,128], index: 2, kind: output, shape index: {0}]   ;;  %s946_s3 = inlined_call_operand.vmem [shape: f32[1,2,128], index: 3, kind: output, shape index: {1}]  }
   0x1   :  { %v653_v0 = vld [vmem:[%s943_s1 + $0x38] sm:$0xff]  ;;  %v652_v2 = vld [vmem:[%s943_s1 + $0x30] sm:$0xff]  ;;  %v651_v4 = vld [vmem:[%s943_s1 + $0x28] sm:$0xff] }
   0x2   :  { %v661_v1 = vld [vmem:[%s943_s1 + $0x78] sm:$0xff]  ;;  %237 = vmatpush.bf16.msra.mxu0 %v653_v0  ;;  %v660_v3 = vld [vmem:[%s943_s1 + $0x70] sm:$0xff]  ;;  %709 = vmatpush.bf16.msra.mxu2 %v653_v0  ;;  %v659_v5 = vld [vmem:[%s943_s1 + $0x68] sm:$0xff] }
   0x3   :  { %286 = vmatpush.bf16.msra.mxu1 %v661_v1  ;;  %717 = vmatpush.bf16.msra.mxu3 %v661_v1  ;;  %v650_v6 = vld [vmem:[%s943_s1 + $0x20] sm:$0xff]  ;;  %v649_v8 = vld [vmem:[%s943_s1 + $0x18] sm:$0xff]  ;;  %v648_v10 = vld [vmem:[%s943_s1 + $0x10] sm:$0xff] }
   0x4   :  { %v658_v7 = vld [vmem:[%s943_s1 + $0x60] sm:$0xff]  ;;  %v657_v9 = vld [vmem:[%s943_s1 + $0x58] sm:$0xff]  ;;  %v656_v11 = vld [vmem:[%s943_s1 + $0x50] sm:$0xff] }
   0x5   :  { %v647_v12 = vld [vmem:[%s943_s1 + $0x8] sm:$0xff]  ;;  %v646_v14 = vld [vmem:[%s943_s1] sm:$0xff]  ;;  %v512_v28 = vld [vmem:[%s944_s0 + $0x10] sm:$0xf] }
   0x6   :  { %238 = vmatpush.bf16.msra.mxu0 %v652_v2  ;;  %710 = vmatpush.bf16.msra.mxu2 %v652_v2  ;;  %v655_v13 = vld [vmem:[%s943_s1 + $0x48] sm:$0xff]  ;;  %v654_v15 = vld [vmem:[%s943_s1 + $0x40] sm:$0xff]  ;;  %v633_v29 = vld [vmem:[%s944_s0 + $0x14] sm:$0xf0] }
   0x7   :  { %287 = vmatpush.bf16.msra.mxu1 %v660_v3  ;;  %718 = vmatpush.bf16.msra.mxu3 %v660_v3  ;;  %v504_v16 = vld [vmem:[%s944_s0] sm:$0xf]  ;;  %v631_v17 = vld [vmem:[%s944_s0 + $0x4] sm:$0xf0]  ;;  %v630_v18 = vld [vmem:[%s944_s0 + $0x4] sm:$0xf]  ;;  %v513_v36 = vor.u32 %v633_v29, %v512_v28 }
   0x8   :  { %v506_v19 = vld [vmem:[%s944_s0 + $0x8] sm:$0xf0]  ;;  %v536_v20 = vld [vmem:[%s944_s0 + $0x40] sm:$0xf]  ;;  %v639_v21 = vld [vmem:[%s944_s0 + $0x44] sm:$0xf0]  ;;  %v505_v24 = vor.u32 %v631_v17, %v504_v16 }
   0x9   :  { %v638_v22 = vld [vmem:[%s944_s0 + $0x44] sm:$0xf]  ;;  %v538_v23 = vld [vmem:[%s944_s0 + $0x48] sm:$0xf0]  ;;  %v509_v25 = vor.u32 %v630_v18, %v506_v19  ;;  %v537_v26 = vor.u32 %v639_v21, %v536_v20  ;;  %v632_v30 = vld [vmem:[%s944_s0 + $0x14] sm:$0xf] }
   0xa   :  { %239 = vmatpush.bf16.msra.mxu0 %v651_v4  ;;  %711 = vmatpush.bf16.msra.mxu2 %v651_v4  ;;  %v541_v27 = vor.u32 %v638_v22, %v538_v23  ;;  %v514_v31 = vld [vmem:[%s944_s0 + $0x18] sm:$0xf0]  ;;  %v544_v32 = vld [vmem:[%s944_s0 + $0x50] sm:$0xf]  ;;  %v641_v33 = vld [vmem:[%s944_s0 + $0x54] sm:$0xf0] }
   0xb   :  { %288 = vmatpush.bf16.msra.mxu1 %v659_v5  ;;  %719 = vmatpush.bf16.msra.mxu3 %v659_v5  ;;  %v640_v34 = vld [vmem:[%s944_s0 + $0x54] sm:$0xf]  ;;  %v546_v35 = vld [vmem:[%s944_s0 + $0x58] sm:$0xf0]  ;;  %v517_v37 = vor.u32 %v632_v30, %v514_v31  ;;  %v545_v38 = vor.u32 %v641_v33, %v544_v32  ;;  %v520_v40 = vld [vmem:[%s944_s0 + $0x20] sm:$0xf] }
   0xc   :  { %v549_v39 = vor.u32 %v640_v34, %v546_v35  ;;  %v635_v41 = vld [vmem:[%s944_s0 + $0x24] sm:$0xf0]  ;;  %v634_v42 = vld [vmem:[%s944_s0 + $0x24] sm:$0xf]  ;;  %v522_v43 = vld [vmem:[%s944_s0 + $0x28] sm:$0xf0] }
   0xd   :  { %v552_v44 = vld [vmem:[%s944_s0 + $0x60] sm:$0xf]  ;;  %v643_v45 = vld [vmem:[%s944_s0 + $0x64] sm:$0xf0]  ;;  %v642_v46 = vld [vmem:[%s944_s0 + $0x64] sm:$0xf]  ;;  %v521_v48 = vor.u32 %v635_v41, %v520_v40  ;;  %v525_v49 = vor.u32 %v634_v42, %v522_v43 }
   0xe   :  { %240 = vmatpush.bf16.msra.mxu0 %v650_v6  ;;  %712 = vmatpush.bf16.msra.mxu2 %v650_v6  ;;  %v554_v47 = vld [vmem:[%s944_s0 + $0x68] sm:$0xf0]  ;;  %v553_v50 = vor.u32 %v643_v45, %v552_v44  ;;  %v528_v52 = vld [vmem:[%s944_s0 + $0x30] sm:$0xf]  ;;  %v637_v53 = vld [vmem:[%s944_s0 + $0x34] sm:$0xf0] }
   0xf   :  { %289 = vmatpush.bf16.msra.mxu1 %v658_v7  ;;  %720 = vmatpush.bf16.msra.mxu3 %v658_v7  ;;  %v557_v51 = vor.u32 %v642_v46, %v554_v47  ;;  %v636_v54 = vld [vmem:[%s944_s0 + $0x34] sm:$0xf]  ;;  %v530_v55 = vld [vmem:[%s944_s0 + $0x38] sm:$0xf0]  ;;  %v560_v56 = vld [vmem:[%s944_s0 + $0x70] sm:$0xf]  ;;  %v529_v60 = vor.u32 %v637_v53, %v528_v52 }
  0x10   :  { %v645_v57 = vld [vmem:[%s944_s0 + $0x74] sm:$0xf0]  ;;  %v644_v58 = vld [vmem:[%s944_s0 + $0x74] sm:$0xf]  ;;  %v562_v59 = vld [vmem:[%s944_s0 + $0x78] sm:$0xf0]  ;;  %v533_v61 = vor.u32 %v636_v54, %v530_v55 }
  0x11   :  { %v561_v62 = vor.u32 %v645_v57, %v560_v56  ;;  %v565_v63 = vor.u32 %v644_v58, %v562_v59 }
  0x12   :  { %241 = vmatpush.bf16.msra.mxu0 %v649_v8  ;;  %713 = vmatpush.bf16.msra.mxu2 %v649_v8 }
  0x13   :  { %290 = vmatpush.bf16.msra.mxu1 %v657_v9  ;;  %721 = vmatpush.bf16.msra.mxu3 %v657_v9 }
  0x16   :  { %242 = vmatpush.bf16.msra.mxu0 %v648_v10  ;;  %714 = vmatpush.bf16.msra.mxu2 %v648_v10 }
  0x17   :  { %291 = vmatpush.bf16.msra.mxu1 %v656_v11  ;;  %722 = vmatpush.bf16.msra.mxu3 %v656_v11 }
  0x1a   :  { %243 = vmatpush.bf16.msra.mxu0 %v647_v12  ;;  %715 = vmatpush.bf16.msra.mxu2 %v647_v12 }
  0x1b   :  { %292 = vmatpush.bf16.msra.mxu1 %v655_v13  ;;  %723 = vmatpush.bf16.msra.mxu3 %v655_v13 }
  0x1e   :  { %244 = vmatpush.bf16.msra.mxu0 %v646_v14  ;;  %716 = vmatpush.bf16.msra.mxu2 %v646_v14 }
  0x1f   :  { %293 = vmatpush.bf16.msra.mxu1 %v654_v15  ;;  %724 = vmatpush.bf16.msra.mxu3 %v654_v15 }
  0x21   :  { %245 = vmatmul.bf16.vlgmr.msra.gmra.mxu0 %v505_v24  ;;  %265 = vmatmul.bf16.vlgmr.msra.gmra.mxu2 %v537_v26 }
  0x22   :  { %294 = vmatmul.bf16.vlgmr.msra.gmra.mxu1 %v509_v25  ;;  %314 = vmatmul.bf16.vlgmr.msra.gmra.mxu3 %v541_v27 }
  0x31   :  { %250 = vmatmul.bf16.gmra.mxu0 %v513_v36  ;;  %270 = vmatmul.bf16.gmra.mxu2 %v545_v38 }
  0x32   :  { %299 = vmatmul.bf16.gmra.mxu1 %v517_v37  ;;  %319 = vmatmul.bf16.gmra.mxu3 %v549_v39 }
  0x41   :  { %255 = vmatmul.bf16.gmra.mxu0 %v521_v48  ;;  %275 = vmatmul.bf16.gmra.mxu2 %v553_v50 }
  0x42   :  { %304 = vmatmul.bf16.gmra.mxu1 %v525_v49  ;;  %324 = vmatmul.bf16.gmra.mxu3 %v557_v51 }
  0x51   :  { %260 = vmatmul.bf16.gmra.mxu0 %v529_v60  ;;  %280 = vmatmul.bf16.gmra.mxu2 %v561_v62 }
  0x52   :  { %309 = vmatmul.bf16.gmra.mxu1 %v533_v61  ;;  %329 = vmatmul.bf16.gmra.mxu3 %v565_v63 }
  0x9e   :  { %v246_v0 = vpop.f32.mrf.mxu0 }
  0x9f   :  { %v295_v1 = vpop.f32.mrf.mxu1 }
  0xa0   :  { %v296_v6 = vadd.f32 %v295_v1, %v246_v0 }
  0xa2   :  { %v456_v39 = vmul.f32 %v296_v6, %v296_v6 }
  0xa4   :  { %v266_v2 = vpop.f32.mrf.mxu2 }
  0xa5   :  { %v315_v3 = vpop.f32.mrf.mxu3 }
  0xa6   :  { %v248_v4 = vpop.f32.mrf.mxu0  ;;  %v892_v9 = vadd.f32 %v315_v3, %v266_v2 }
  0xa7   :  { %v297_v5 = vpop.f32.mrf.mxu1 }
  0xa8   :  { %v298_v7 = vadd.f32 %v297_v5, %v248_v4 }
  0xaa   :  { %v665_v8 = vpack.c.bf16 %v298_v7, %v296_v6  ;;  %v457_v37 = vmul.f32 %v298_v7, %v298_v7  ;;  %v434_v40 = vadd.f32 %v298_v7, %v296_v6 }
  0xac   :  { %666 = vst [vmem:[%s945_s2] sm:$0xff] %v665_v8   ;;  %v268_v10 = vpop.f32.mrf.mxu2  ;;  %v472_v47 = vadd.f32 %v457_v37, %v456_v39  ;;  %v464_v8 = vmul.f32 %v892_v9, %v892_v9 }
  0xad   :  { %v317_v11 = vpop.f32.mrf.mxu3 }
  0xae   :  { %v251_v12 = vpop.f32.mrf.mxu0  ;;  %v894_v14 = vadd.f32 %v317_v11, %v268_v10 }
  0xaf   :  { %v300_v13 = vpop.f32.mrf.mxu1 }
  0xb0   :  { %v685_v15 = vpack.c.bf16 %v894_v14, %v892_v9  ;;  %v301_v20 = vadd.f32 %v300_v13, %v251_v12  ;;  %v465_v13 = vmul.f32 %v894_v14, %v894_v14 }
  0xb2   :  { %705 = vst [vmem:[%s945_s2 + $0x20] sm:$0xff] %v685_v15   ;;  %v458_v41 = vmul.f32 %v301_v20, %v301_v20  ;;  %v435_v48 = vadd.f32 %v434_v40, %v301_v20 }
  0xb4   :  { %v271_v16 = vpop.f32.mrf.mxu2  ;;  %v473_v51 = vadd.f32 %v472_v47, %v458_v41 }
  0xb5   :  { %v320_v17 = vpop.f32.mrf.mxu3 }
  0xb6   :  { %v253_v18 = vpop.f32.mrf.mxu0  ;;  %v904_v23 = vadd.f32 %v320_v17, %v271_v16 }
  0xb7   :  { %v302_v19 = vpop.f32.mrf.mxu1 }
  0xb8   :  { %v303_v21 = vadd.f32 %v302_v19, %v253_v18 }
  0xba   :  { %v670_v22 = vpack.c.bf16 %v303_v21, %v301_v20  ;;  %v459_v49 = vmul.f32 %v303_v21, %v303_v21  ;;  %v436_v52 = vadd.f32 %v435_v48, %v303_v21  ;;  %v466_v20 = vmul.f32 %v904_v23, %v904_v23 }
  0xbc   :  { %702 = vst [vmem:[%s945_s2 + $0x8] sm:$0xff] %v670_v22   ;;  %v273_v24 = vpop.f32.mrf.mxu2  ;;  %v474_v55 = vadd.f32 %v473_v51, %v459_v49 }
  0xbd   :  { %v322_v25 = vpop.f32.mrf.mxu3 }
  0xbe   :  { %v256_v26 = vpop.f32.mrf.mxu0  ;;  %v906_v28 = vadd.f32 %v322_v25, %v273_v24 }
  0xbf   :  { %v305_v27 = vpop.f32.mrf.mxu1 }
  0xc0   :  { %v690_v29 = vpack.c.bf16 %v906_v28, %v904_v23  ;;  %v306_v34 = vadd.f32 %v305_v27, %v256_v26 }
  0xc2   :  { %706 = vst [vmem:[%s945_s2 + $0x28] sm:$0xff] %v690_v29   ;;  %v460_v53 = vmul.f32 %v306_v34, %v306_v34  ;;  %v437_v56 = vadd.f32 %v436_v52, %v306_v34 }
  0xc4   :  { %v276_v30 = vpop.f32.mrf.mxu2  ;;  %v475_v58 = vadd.f32 %v474_v55, %v460_v53 }
  0xc5   :  { %v325_v31 = vpop.f32.mrf.mxu3 }
  0xc6   :  { %v258_v32 = vpop.f32.mrf.mxu0  ;;  %v326_v38 = vadd.f32 %v325_v31, %v276_v30 }
  0xc7   :  { %v307_v33 = vpop.f32.mrf.mxu1 }
  0xc8   :  { %v308_v35 = vadd.f32 %v307_v33, %v258_v32 }
  0xca   :  { %v675_v36 = vpack.c.bf16 %v308_v35, %v306_v34  ;;  %v461_v57 = vmul.f32 %v308_v35, %v308_v35  ;;  %v438_v59 = vadd.f32 %v437_v56, %v308_v35 }
  0xcc   :  { %703 = vst [vmem:[%s945_s2 + $0x10] sm:$0xff] %v675_v36   ;;  %v278_v42 = vpop.f32.mrf.mxu2  ;;  %v476_v1 = vadd.f32 %v475_v58, %v461_v57 }
  0xcd   :  { %v327_v43 = vpop.f32.mrf.mxu3 }
  0xce   :  { %v261_v44 = vpop.f32.mrf.mxu0  ;;  %v328_v46 = vadd.f32 %v327_v43, %v278_v42 }
  0xcf   :  { %v310_v45 = vpop.f32.mrf.mxu1 }
  0xd0   :  { %v695_v50 = vpack.c.bf16 %v328_v46, %v326_v38  ;;  %v311_v54 = vadd.f32 %v310_v45, %v261_v44  ;;  %v469_v30 = vmul.f32 %v328_v46, %v328_v46 }
  0xd2   :  { %707 = vst [vmem:[%s945_s2 + $0x30] sm:$0xff] %v695_v50   ;;  %v462_v60 = vmul.f32 %v311_v54, %v311_v54  ;;  %v439_v2 = vadd.f32 %v438_v59, %v311_v54 }
  0xd4   :  { %v281_v61 = vpop.f32.mrf.mxu2  ;;  %v477_v4 = vadd.f32 %v476_v1, %v462_v60 }
  0xd5   :  { %v330_v62 = vpop.f32.mrf.mxu3 }
  0xd6   :  { %v263_v63 = vpop.f32.mrf.mxu0  ;;  %v331_v12 = vadd.f32 %v330_v62, %v281_v61 }
  0xd7   :  { %v312_v0 = vpop.f32.mrf.mxu1 }
  0xd8   :  { %v313_v3 = vadd.f32 %v312_v0, %v263_v63 }
  0xda   :  { %v680_v5 = vpack.c.bf16 %v313_v3, %v311_v54  ;;  %v440_v6 = vadd.f32 %v439_v2, %v313_v3  ;;  %v463_v7 = vmul.f32 %v313_v3, %v313_v3 }
  0xdc   :  { %704 = vst [vmem:[%s945_s2 + $0x18] sm:$0xff] %v680_v5   ;;  %v441_v10 = vadd.f32 %v440_v6, %v892_v9  ;;  %v478_v11 = vadd.f32 %v477_v4, %v463_v7  ;;  %v283_v17 = vpop.f32.mrf.mxu2  ;;  %v467_v9 = vmul.f32 %v906_v28, %v906_v28 }
  0xdd   :  { %v332_v18 = vpop.f32.mrf.mxu3 }
  0xde   :  { %v442_v15 = vadd.f32 %v441_v10, %v894_v14  ;;  %v479_v16 = vadd.f32 %v478_v11, %v464_v8  ;;  %v333_v19 = vadd.f32 %v332_v18, %v283_v17  ;;  %v468_v14 = vmul.f32 %v326_v38, %v326_v38 }
  0xe0   :  { %v443_v21 = vadd.f32 %v442_v15, %v904_v23  ;;  %v480_v22 = vadd.f32 %v479_v16, %v465_v13  ;;  %v700_v24 = vpack.c.bf16 %v333_v19, %v331_v12  ;;  %v470_v23 = vmul.f32 %v331_v12, %v331_v12 }
  0xe1   :  { %v471_v37 = vmul.f32 %v333_v19, %v333_v19 }
  0xe2   :  { %v481_v25 = vadd.f32 %v480_v22, %v466_v20  ;;  %v444_v26 = vadd.f32 %v443_v21, %v906_v28  ;;  %708 = vst [vmem:[%s945_s2 + $0x38] sm:$0xff] %v700_v24  }
  0xe4   :  { %v445_v27 = vadd.f32 %v444_v26, %v326_v38  ;;  %v482_v29 = vadd.f32 %v481_v25, %v467_v9 }
  0xe6   :  { %v446_v31 = vadd.f32 %v445_v27, %v328_v46  ;;  %v483_v32 = vadd.f32 %v482_v29, %v468_v14 }
  0xe8   :  { %v447_v33 = vadd.f32 %v446_v31, %v331_v12  ;;  %v484_v34 = vadd.f32 %v483_v32, %v469_v30 }
  0xea   :  { %v485_v35 = vadd.f32 %v484_v34, %v470_v23  ;;  %v448_v36 = vadd.f32 %v447_v33, %v333_v19 }
  0xec   :  { %v449_v39 = vrot.slane %v448_v36, 4  ;;  %v486_v40 = vadd.f32 %v485_v35, %v471_v37 }
  0xee   :  { %v450_v41 = vadd.f32 %v449_v39, %v448_v36  ;;  %v487_v28 = vrot.slane %v486_v40, 4 }
  0xf0   :  { %v451_v42 = vrot.slane %v450_v41, 2  ;;  %v488_v43 = vadd.f32 %v487_v28, %v486_v40 }
  0xf2   :  { %v452_v44 = vadd.f32 %v451_v42, %v450_v41  ;;  %v489_v45 = vrot.slane %v488_v43, 2 }
  0xf4   :  { %v453_v47 = vrot.slane %v452_v44, 1  ;;  %v490_v38 = vadd.f32 %v489_v45, %v488_v43 }
  0xf6   :  { %v454_v48 = vadd.f32 %v453_v47, %v452_v44  ;;  %v491_v49 = vrot.slane %v490_v38, 1 }
  0xf8   :  { %455 = vst [vmem:[%s946_s3] sm:$0x1] %v454_v48  ;;  %v492_v46 = vadd.f32 %v491_v49, %v490_v38 }
  0xfa   :  { %493 = vst [vmem:[%s946_s3 + $0x1] sm:$0x1] %v492_v46 }

</bundles_post_ra>
